<compile_context>
chip_gen: v6e
topology: v6e:2x2x1
jax: 0.10.0
libtpu: 0.0.40
codegen_flags: <defaults>
</compile_context>

<pallas_src>
import jax
import jax.numpy as jnp
from jax.experimental import pallas as pl
from jax.experimental.pallas import tpu as pltpu


EMB_SIZE = 256     # emd_size in the module
CLIP_DIM = 512     # CLIP embedding dim consumed by LangEmbedding
HIDDEN = 256       # hidden width of the projection MLP


def _round_up(x, m):
    return pl.cdiv(x, m) * m


def _lang_embedding_kernel(x_ref, w1_ref, b1_ref, w2_ref, b2_ref, o_ref):
    """Fused 2-layer MLP on one (TM, 512) batch tile.

    x / W1 / W2 are bf16 (MXU-native); biases, accumulation and output are f32.
    """
    h = jnp.dot(x_ref[...], w1_ref[...], preferred_element_type=jnp.float32)
    h = jnp.maximum(h + b1_ref[...], 0.0)                       # (TM, 256) f32
    o = jnp.dot(h.astype(jnp.bfloat16), w2_ref[...],
                preferred_element_type=jnp.float32)
    o_ref[...] = (o + b2_ref[...]).astype(o_ref.dtype)          # (TM, 256)


def clip_sensor_model_forward(obs, w1, b1, w2, b2, *, block_m=512):
    """obs: (B, 512) -> (B, 256) float32."""
    B = obs.shape[0]

    # bf16 on the MXU path; biases stay f32.
    obs_bf = obs.astype(jnp.bfloat16)
    w1_bf = w1.astype(jnp.bfloat16)
    w2_bf = w2.astype(jnp.bfloat16)
    b1 = b1.astype(jnp.float32).reshape(1, HIDDEN)
    b2 = b2.astype(jnp.float32).reshape(1, EMB_SIZE)

    # Batch tile: multiple of 8 sublanes, capped at block_m rows.  Pad B up to
    # a whole number of tiles; padded rows are sliced off at the end.
    tm = int(min(block_m, _round_up(B, 8)))
    b_pad = int(_round_up(B, tm))
    if b_pad != B:
        obs_bf = jnp.pad(obs_bf, ((0, b_pad - B), (0, 0)))
    grid = (b_pad // tm,)

    flops = 2 * b_pad * (CLIP_DIM * HIDDEN + HIDDEN * EMB_SIZE)
    bytes_accessed = (
        b_pad * CLIP_DIM * 2          # x (bf16)
        + CLIP_DIM * HIDDEN * 2       # W1 (bf16)
        + HIDDEN * EMB_SIZE * 2       # W2 (bf16)
        + (HIDDEN + EMB_SIZE) * 4     # biases (f32)
        + b_pad * EMB_SIZE * 4        # out (f32)
    )

    out = pl.pallas_call(
        _lang_embedding_kernel,
        out_shape=jax.ShapeDtypeStruct((b_pad, EMB_SIZE), jnp.float32),
        grid_spec=pltpu.PrefetchScalarGridSpec(
            num_scalar_prefetch=0,
            grid=grid,
            in_specs=[
                pl.BlockSpec((tm, CLIP_DIM), lambda i: (i, 0)),        # x tile
                pl.BlockSpec((CLIP_DIM, HIDDEN), lambda i: (0, 0)),    # W1 (resident)
                pl.BlockSpec((1, HIDDEN), lambda i: (0, 0)),           # b1 (resident)
                pl.BlockSpec((HIDDEN, EMB_SIZE), lambda i: (0, 0)),    # W2 (resident)
                pl.BlockSpec((1, EMB_SIZE), lambda i: (0, 0)),         # b2 (resident)
            ],
            out_specs=pl.BlockSpec((tm, EMB_SIZE), lambda i: (i, 0)),
        ),
        compiler_params=pltpu.CompilerParams(
            dimension_semantics=("parallel",),   # shard batch tiles across TCs on v7x
        ),
        cost_estimate=pl.CostEstimate(
            flops=flops, bytes_accessed=bytes_accessed, transcendentals=0),
    )(obs_bf, w1_bf, b1, w2_bf, b2)

    return out[:B]


def init_params(key):
    """Deterministic params, PyTorch-nn.Linear-style uniform init (f32 master)."""
    k1, k2, k3, k4 = jax.random.split(key, 4)
    lim1 = 1.0 / (CLIP_DIM ** 0.5)
    lim2 = 1.0 / (HIDDEN ** 0.5)
    w1 = jax.random.uniform(k1, (CLIP_DIM, HIDDEN), jnp.float32, -lim1, lim1)
    b1 = jax.random.uniform(k2, (1, HIDDEN), jnp.float32, -lim1, lim1)
    w2 = jax.random.uniform(k3, (HIDDEN, EMB_SIZE), jnp.float32, -lim2, lim2)
    b2 = jax.random.uniform(k4, (1, EMB_SIZE), jnp.float32, -lim2, lim2)
    return w1, b1, w2, b2


def reference_forward(obs, w1, b1, w2, b2):
    """Plain-JAX f32 reference for correctness checking."""
    h = jnp.maximum(obs @ w1 + b1, 0.0)
    return h @ w2 + b2


if __name__ == "__main__":
    key = jax.random.PRNGKey(0)
    k_obs, k_params = jax.random.split(key)

    # B=80 with block_m=32 exercises a multi-step grid (3 tiles) and the
    # pad-to-tile path (80 -> 96 rows).  Production callers should use the
    # default block_m=512 and batch many CLIP embeddings per call (M >= 256)
    # to actually load the MXU.
    batch = 80
    obs = jax.random.normal(k_obs, (batch, CLIP_DIM), dtype=jnp.float32)
    w1, b1, w2, b2 = init_params(k_params)

    out = clip_sensor_model_forward(obs, w1, b1, w2, b2, block_m=32)
    out = jax.block_until_ready(out)

    ref = reference_forward(obs, w1, b1, w2, b2)
    assert out.shape == (batch, EMB_SIZE)
    # bf16 matmul operands -> loosened tolerance vs. the f32 reference.
    assert jnp.allclose(out, ref, atol=5e-2, rtol=5e-2)

    print("KERNEL_OK")
</pallas_src>

<mosaic_0001>
module attributes {stable_mosaic.version = 11 : i64} {
  func.func @_lang_embedding_kernel(%arg0: i32, %arg1: memref<32x512xbf16, #tpu.memory_space<vmem>>, %arg2: memref<512x256xbf16, #tpu.memory_space<vmem>>, %arg3: memref<1x256xf32, #tpu.memory_space<vmem>>, %arg4: memref<256x256xbf16, #tpu.memory_space<vmem>>, %arg5: memref<1x256xf32, #tpu.memory_space<vmem>>, %arg6: memref<32x256xf32, #tpu.memory_space<vmem>>) attributes {dimension_semantics = [#tpu.dimension_semantics<parallel>], iteration_bounds = array<i64: 3>, scalar_prefetch = 0 : i64, scratch_operands = 0 : i64, tpu.core_type = #tpu.core_type<tc>, window_params = [{transform_indices = @transform_0, window_bounds = array<i64: 32, 512>}, {pipeline_mode = #tpu.pipeline_mode<synchronous>, transform_indices = @transform_1, window_bounds = array<i64: 512, 256>}, {pipeline_mode = #tpu.pipeline_mode<synchronous>, transform_indices = @transform_2, window_bounds = array<i64: 1, 256>}, {pipeline_mode = #tpu.pipeline_mode<synchronous>, transform_indices = @transform_3, window_bounds = array<i64: 256, 256>}, {pipeline_mode = #tpu.pipeline_mode<synchronous>, transform_indices = @transform_4, window_bounds = array<i64: 1, 256>}, {transform_indices = @transform_5, window_bounds = array<i64: 32, 256>}]} {
    %c0 = arith.constant 0 : index
    %c0_0 = arith.constant 0 : index
    %0 = vector.load %arg1[%c0, %c0_0] : memref<32x512xbf16, #tpu.memory_space<vmem>>, vector<32x512xbf16>
    %c0_1 = arith.constant 0 : index
    %c0_2 = arith.constant 0 : index
    %1 = vector.load %arg2[%c0_1, %c0_2] : memref<512x256xbf16, #tpu.memory_space<vmem>>, vector<512x256xbf16>
    %cst = arith.constant dense<0.000000e+00> : vector<32x256xf32>
    %2 = tpu.matmul %0, %1, %cst {dimension_numbers = #tpu.dot_dimension_numbers<[1], [0], [0], [1], [0, 0, 1, 1], [], []>} : vector<32x512xbf16>, vector<512x256xbf16>, vector<32x256xf32> -> vector<32x256xf32>
    %c0_3 = arith.constant 0 : index
    %c0_4 = arith.constant 0 : index
    %3 = vector.load %arg3[%c0_3, %c0_4] : memref<1x256xf32, #tpu.memory_space<vmem>>, vector<1x256xf32>
    %4 = vector.broadcast %3 : vector<1x256xf32> to vector<32x256xf32>
    %5 = arith.addf %2, %4 : vector<32x256xf32>
    %cst_5 = arith.constant 0.000000e+00 : f32
    %6 = vector.broadcast %cst_5 : f32 to vector<32x256xf32>
    %7 = arith.maximumf %5, %6 : vector<32x256xf32>
    %8 = arith.truncf %7 : vector<32x256xf32> to vector<32x256xbf16>
    %c0_6 = arith.constant 0 : index
    %c0_7 = arith.constant 0 : index
    %9 = vector.load %arg4[%c0_6, %c0_7] : memref<256x256xbf16, #tpu.memory_space<vmem>>, vector<256x256xbf16>
    %cst_8 = arith.constant dense<0.000000e+00> : vector<32x256xf32>
    %10 = tpu.matmul %8, %9, %cst_8 {dimension_numbers = #tpu.dot_dimension_numbers<[1], [0], [0], [1], [0, 0, 1, 1], [], []>} : vector<32x256xbf16>, vector<256x256xbf16>, vector<32x256xf32> -> vector<32x256xf32>
    %c0_9 = arith.constant 0 : index
    %c0_10 = arith.constant 0 : index
    %11 = vector.load %arg5[%c0_9, %c0_10] : memref<1x256xf32, #tpu.memory_space<vmem>>, vector<1x256xf32>
    %12 = vector.broadcast %11 : vector<1x256xf32> to vector<32x256xf32>
    %13 = arith.addf %10, %12 : vector<32x256xf32>
    %c0_11 = arith.constant 0 : index
    %c0_12 = arith.constant 0 : index
    %14 = vector.load %arg6[%c0_11, %c0_12] : memref<32x256xf32, #tpu.memory_space<vmem>>, vector<32x256xf32>
    tpu.vector_store %arg6[%c0_11, %c0_12], %13 {strides = array<i32>} : memref<32x256xf32, #tpu.memory_space<vmem>>, vector<32x256xf32>,
    return
  }
  func.func @transform_0(%arg0: i32) -> (i32, i32) {
    %c0_i32 = arith.constant 0 : i32
    %c0_i32_0 = arith.constant 0 : i32
    return %arg0, %c0_i32 : i32, i32
  }
  func.func @transform_1(%arg0: i32) -> (i32, i32) {
    %c0_i32 = arith.constant 0 : i32
    %c0_i32_0 = arith.constant 0 : i32
    %c0_i32_1 = arith.constant 0 : i32
    return %c0_i32, %c0_i32_0 : i32, i32
  }
  func.func @transform_2(%arg0: i32) -> (i32, i32) {
    %c0_i32 = arith.constant 0 : i32
    %c0_i32_0 = arith.constant 0 : i32
    %c0_i32_1 = arith.constant 0 : i32
    return %c0_i32, %c0_i32_0 : i32, i32
  }
  func.func @transform_3(%arg0: i32) -> (i32, i32) {
    %c0_i32 = arith.constant 0 : i32
    %c0_i32_0 = arith.constant 0 : i32
    %c0_i32_1 = arith.constant 0 : i32
    return %c0_i32, %c0_i32_0 : i32, i32
  }
  func.func @transform_4(%arg0: i32) -> (i32, i32) {
    %c0_i32 = arith.constant 0 : i32
    %c0_i32_0 = arith.constant 0 : i32
    %c0_i32_1 = arith.constant 0 : i32
    return %c0_i32, %c0_i32_0 : i32, i32
  }
  func.func @transform_5(%arg0: i32) -> (i32, i32) {
    %c0_i32 = arith.constant 0 : i32
    %c0_i32_0 = arith.constant 0 : i32
    return %arg0, %c0_i32 : i32, i32
  }
}

</mosaic_0001>

<bundles_post_ra>
// kernel: tpu_custom_call.1
= control target key start
LH: loop header
LB: loop body
LE: loop exit
PB: predicated region body
PF: predicated region fallthrough
CT: control target
= control target key end

     0   :  { %10 = vsyncpa [#allocation3], 0  ;;  %s1994_s0 = inlined_call_operand.hbm [shape: bf16[96,512], index: 0, kind: input, shape index: {}]   ;;  %s1995_s1 = inlined_call_operand.hbm [shape: bf16[512,256], index: 1, kind: input, shape index: {}]   ;;  %s1996_s2 = inlined_call_operand.vmem [shape: f32[1,256], index: 2, kind: input, shape index: {}]   ;;  %s1997_s3 = inlined_call_operand.hbm [shape: bf16[256,256], index: 3, kind: input, shape index: {}]   ;;  %s1998_s4 = inlined_call_operand.vmem [shape: f32[1,256], index: 4, kind: input, shape index: {}]   ;;  %s1999_s5 = inlined_call_operand.hbm [shape: f32[96,256], index: 5, kind: output, shape index: {}]  }
   0x1   :  { %12 = vsyncpa [#allocation3 + $0x1], 0 }
   0x2   :  { %13 = vsyncpa [#allocation6], 0 }
   0x3   :  { %14 = vsyncpa [#allocation4], 0 }
   0x4   :  { %16 = vsyncpa [#allocation4 + $0x1], 0  ;;  %s1788_s18 = smov 0   ;;  %s1790_s19 = smov 0  }
   0x5   :  { %s1792_s20 = smov 0   ;;  %s1794_s21 = smov 0  }
   0x6 LB: > { %s1809_s22 = sadd.s32 4294967295, %s1746_s21   ;;  %s1209_s23 = sadd.s32 4294967294, %s1746_s21   ;;  %s1746_s21 = sphi %s1794_s21, %s2020_s21   ;;  %s1742_s20 = sphi %s1792_s20, %s2019_s20   ;;  %s1738_s19 = sphi %s1790_s19, %s2018_s19   ;;  %s1734_s18 = sphi %s1788_s18, %s2017_s18  }
   0x7   : > { %p42_p0 = scmp.ne.s32.totalorder %s1738_s19, %s1734_s18  ;;  %p2000_p1 = scmp.eq.s32.totalorder %s1809_s22, 0 }
   0x8   : > { %p156_p3 = scmp.eq.s32.totalorder %s1209_s23, 2  ;;  %p1210_p5 = scmp.ge.s32.totalorder %s1746_s21, 1 }
   0x9   : > { %p1818_p4 = por %p2000_p1, %p42_p0  ;;  %p163_p7 = scmp.lt.s32.totalorder %s1746_s21, 4 }
   0xa   : > { %p1823_p6 = por %p156_p3, %p42_p0  ;;  %s1748_s27 = smov [#allocation5]  }
   0xb   : > { %s2004_s24 = scalar_select %p1818_p4, 1, 0 }
   0xc   : > { %s2005_s25 = scalar_select %p1823_p6, 1, 0 }
   0xd   : > { %p1828_p8 = pnand %p1210_p5, %p163_p7  ;;  %s175_s28 = sshll.u32 %s1748_s27, 4  ;;  %s176_s28 = int_to_ptr.vmem [resolvable:$true] %s175_s28 }
   0xe   : > { %s1749_s30 = smov [#allocation7]   ;;  %s1609_s7 = scalar_lea.vmem %s176_s28, 8192 }
   0xf   : > { %s2006_s26 = scalar_select %p1828_p8, 1, 0 }
  0x10   : > { %p1381_p9 = pneg %p1828_p8  ;;  %s191_s6 = sshll.u32 %s1749_s30, 4  ;;  %s192_s6 = int_to_ptr.vmem [resolvable:$true] %s191_s6 }
  0x11   : > { %p1610_p12 = scmp.ne.s32.totalorder %s176_s28, %s1609_s7  ;;  %p1617_p3 = scmp.lt.s32.totalorder %s176_s28, %s176_s28 }
  0x12   : > { %p1836_p10 = pnand %p1381_p9, %p2000_p1  ;;  %p1618_p5 = scmp.lt.s32.totalorder %s1609_s7, %s1609_s7 }
  0x14   : > { %p1600_p11 = pneg %p1836_p10  ;;  %p1619_p7 = por %p1618_p5, %p1617_p3 }
  0x16   : > { %p1612_p13 = pnand %p1610_p12, %p1600_p11 }
  0x18   : > { %p1613_p0 = pneg %p1612_p13 }
  0x1a   : > { %p1620_p9 = pnand %p1619_p7, %p1613_p0 }
  0x1c   : > { %1623 = shalt.err (!%p1620_p9)
}
  0x1d   : > { %s1750_s8 = smov 128   ;;  %s1751_s9 = smov 8  }
  0x1e   : > { %1384 = dma.hbm_to_vmem [thread:$0]  (!%p1836_p10), %s1995_s1, 8192, %s176_s28, [#allocation6], %s1750_s8, %s1750_s8, %s1751_s9  }
  0x1f   : > { %s1635_s12 = scalar_lea.vmem %s192_s6, 4096  ;;  %p1643_p2 = scmp.lt.s32.totalorder %s192_s6, %s192_s6 }
  0x20   : > { %p1636_p1 = scmp.ne.s32.totalorder %s192_s6, %s1635_s12  ;;  %p1644_p6 = scmp.lt.s32.totalorder %s1635_s12, %s1635_s12 }
  0x22   : > { %p1638_p12 = pnand %p1636_p1, %p1600_p11  ;;  %p1645_p3 = por %p1644_p6, %p1643_p2 }
  0x24   : > { %p1639_p13 = pneg %p1638_p12 }
  0x26   : > { %p1646_p0 = pnand %p1645_p3, %p1639_p13 }
  0x28   : > { %1649 = shalt.err (!%p1646_p0)
}
  0x29   : > { %1387 = dma.hbm_to_vmem [thread:$0]  (!%p1836_p10), %s1997_s3, 4096, %s192_s6, [#allocation6], %s1750_s8, %s1750_s8, %s1751_s9  }
  0x2a   : > { %s1859_s15 = sadd.s32 1, %s1746_s21   ;;  %s29_s16 = sadd.s32 1, %s1742_s20 }
  0x2b   : > { %s26_s17 = ssub.s32 %s1746_s21, %s1859_s15  ;;  %p36_p1 = scmp.ne.s32.totalorder %s1742_s20, %s1738_s19 }
  0x2c   : > { %p27_p2 = scmp.eq.s32.totalorder %s26_s17, 0  ;;  %p37_p6 = scmp.eq.s32.totalorder %s1746_s21, 0 }
  0x2d   : > { %p2008_p11 = scmp.eq.s32.totalorder %s1809_s22, 2  ;;  %p1398_p7 = scmp.lt.s32.totalorder %s1746_s21, 3 }
  0x2e   : > { %s1875_s27 = scalar_select %p27_p2, %s1742_s20, %s29_s16  }
  0x2f   : > { %p1869_p5 = por %p2008_p11, %p36_p1  ;;  %p38_p9 = por %p37_p6, %p36_p1 }
  0x30   : > { %s208_s28 = sand.u32 1, %s1742_s20   ;;  %s1334_s30 = sshll.u32 %s1746_s21, 10 }
  0x31   : > { %s2009_s23 = scalar_select %p1869_p5, 1, 0 }
  0x32   : > { %s1214_s29 = sshll.u32 %s208_s28, 6  ;;  %s1882_s8 = scalar_lea.hbm %s1994_s0, %s1334_s30 }
  0x33   : > { %s212_s9 = scalar_lea.vmem [#allocation2], %s1214_s29  ;;  %p1886_p10 = pnand %p1398_p7, %p38_p9 }
  0x34   : > { %s220_s10 = sshll.u32 %s212_s9, 4  ;;  %s1890_s12 = scalar_lea.sflag [#allocation3], %s208_s28  ;;  %s1884_s10 = int_to_ptr.vmem [resolvable:$true] %s220_s10 }
  0x35   : > { %s1650_s13 = scalar_lea.hbm %s1882_s8, 1024  ;;  %p1652_p13 = pneg %p1886_p10 }
  0x36   : > { %p1651_p12 = scmp.ne.s32.totalorder %s1882_s8, %s1650_s13  ;;  %s1655_s17 = scalar_lea.hbm %s1994_s0, 3072 }
  0x37   : > { %p1656_p1 = scmp.lt.s32.totalorder %s1882_s8, %s1994_s0  ;;  %p1657_p2 = scmp.lt.s32.totalorder %s1655_s17, %s1650_s13 }
  0x38   : > { %p1653_p3 = pnand %p1652_p13, %p1651_p12 }
  0x39   : > { %p1658_p6 = por %p1657_p2, %p1656_p1 }
  0x3a   : > { %p1654_p0 = pneg %p1653_p3 }
  0x3c   : > { %p1659_p11 = pnand %p1658_p6, %p1654_p0 }
  0x3e   : > { %1662 = shalt.err (!%p1659_p11)
}
  0x3f   : > { %s1663_s28 = scalar_lea.vmem %s1884_s10, 1024  ;;  %s1752_s6 = smov [#allocation2]  }
  0x40   : > { %p1664_p7 = scmp.ne.s32.totalorder %s1884_s10, %s1663_s28  ;;  %s1668_s7 = sshll.u32 %s1752_s6, 4  ;;  %s1669_s7 = int_to_ptr.vmem [resolvable:$false] %s1668_s7 }
  0x41   : > { %s1670_s9 = scalar_lea.vmem %s1669_s7, 2048  ;;  %p1671_p3 = scmp.lt.s32.totalorder %s1884_s10, %s1669_s7 }
  0x42   : > { %p1666_p9 = pnand %p1664_p7, %p1652_p13  ;;  %p1672_p5 = scmp.lt.s32.totalorder %s1670_s9, %s1663_s28 }
  0x44   : > { %p1667_p12 = pneg %p1666_p9  ;;  %p1673_p4 = por %p1672_p5, %p1671_p3 }
  0x46   : > { %p1674_p8 = pnand %p1673_p4, %p1667_p12 }
  0x48   : > { %1677 = shalt.err (!%p1674_p8)
}
  0x49   : > { %s1753_s13 = smov 256   ;;  %s1754_s14 = smov 16  }
  0x4a   : > { %1391 = dma.hbm_to_vmem [thread:$0]  (!%p1886_p10), %s1882_s8, 1024, %s1884_s10, %s1890_s12, %s1753_s13, %s1753_s13, %s1754_s14  }
  0x4b   : > { %p2011_p13 = scmp.ne.s32.totalorder %s2006_s26, 0 }
  0x4c   : > { %s1914_s16 = sand.u32 (!%p2011_p13), 1, %s1738_s19   ;;  %p2012_p4 = scmp.ne.s32.totalorder (!%p2011_p13), %s2004_s24, 0 }
  0x4d   : > { %232 = sbr.rel (%p2011_p13) target bundleno = 582 (0x246), region = 40  ;;  %s1219_s17 = sshll.u32 (!%p2011_p13), %s1914_s16, 6 }
  0x4e   : > { %s235_s29 = scalar_lea.sflag (!%p2011_p13), [#allocation3], %s1914_s16  ;;  %s1920_s30 = scalar_lea.vmem (!%p2011_p13), [#allocation2], %s1219_s17 }
  0x52   : > { %1721 = dma.done.wait (%p2012_p4), %s235_s29, 1024  }
  0x53   : > { %1723 = vsyncadd (%p2012_p4), %s235_s29, 4294966272  ;;  %p2013_p8 = scmp.eq.s32.totalorder %s1809_s22, 0 }
  0x55   : > { %1725 = dma.done.wait (%p2013_p8), [#allocation6], 12288   ;;  %p2014_p5 = pmov %p2013_p8 }
  0x56   : > { %v1442_v0 = vld [vmem:[#allocation5 + $0x74] ss:$8 sps:$4 sm:$0xff]   ;;  %v1446_v2 = vld [vmem:[#allocation5 + $0x70] ss:$8 sps:$4 sm:$0xff]   ;;  %v1448_v4 = vld [vmem:[#allocation5 + $0x64] ss:$8 sps:$4 sm:$0xff]  }
  0x57   : > { %1727 = vsyncadd (%p2014_p5), [#allocation6], 4294955008  ;;  %v1444_v1 = vld [vmem:[#allocation5 + $0x174] ss:$8 sps:$4 sm:$0xff]   ;;  %719 = vmatprep.subr.bf16.mxu0 %v1442_v0  ;;  %v1447_v3 = vld [vmem:[#allocation5 + $0x170] ss:$8 sps:$4 sm:$0xff]  }
  0x58   : > { %772 = vmatprep.subr.bf16.mxu1 %v1444_v1  ;;  %720 = vmatpush1.bf16.msra.mxu0 %v1446_v2  ;;  %v1450_v5 = vld [vmem:[#allocation5 + $0x164] ss:$8 sps:$4 sm:$0xff]   ;;  %v1452_v6 = vld [vmem:[#allocation5 + $0x60] ss:$8 sps:$4 sm:$0xff]   ;;  %v1454_v8 = vld [vmem:[#allocation5 + $0x54] ss:$8 sps:$4 sm:$0xff]  }
  0x59   : > { %773 = vmatpush1.bf16.msra.mxu1 %v1447_v3  ;;  %721 = vmatprep.subr.bf16.mxu0 %v1448_v4  ;;  %v1453_v7 = vld [vmem:[#allocation5 + $0x160] ss:$8 sps:$4 sm:$0xff]   ;;  %v1456_v9 = vld [vmem:[#allocation5 + $0x154] ss:$8 sps:$4 sm:$0xff]   ;;  %v1458_v10 = vld [vmem:[#allocation5 + $0x50] ss:$8 sps:$4 sm:$0xff]  }
  0x5a   : > { %774 = vmatprep.subr.bf16.mxu1 %v1450_v5  ;;  %v1459_v11 = vld [vmem:[#allocation5 + $0x150] ss:$8 sps:$4 sm:$0xff]   ;;  %v1460_v12 = vld [vmem:[#allocation5 + $0x44] ss:$8 sps:$4 sm:$0xff]   ;;  %v1464_v14 = vld [vmem:[#allocation5 + $0x40] ss:$8 sps:$4 sm:$0xff]  }
  0x5b   : > { %v1462_v13 = vld [vmem:[#allocation5 + $0x144] ss:$8 sps:$4 sm:$0xff]   ;;  %v1465_v15 = vld [vmem:[#allocation5 + $0x140] ss:$8 sps:$4 sm:$0xff]   ;;  %v1466_v16 = vld [vmem:[#allocation5 + $0x34] ss:$8 sps:$4 sm:$0xff]  }
  0x5c   : > { %722 = vmatpush1.bf16.msra.mxu0 %v1452_v6  ;;  %v1468_v17 = vld [vmem:[#allocation5 + $0x134] ss:$8 sps:$4 sm:$0xff]   ;;  %v1470_v18 = vld [vmem:[#allocation5 + $0x30] ss:$8 sps:$4 sm:$0xff]   ;;  %v1472_v20 = vld [vmem:[#allocation5 + $0x24] ss:$8 sps:$4 sm:$0xff]  }
  0x5d   : > { %775 = vmatpush1.bf16.msra.mxu1 %v1453_v7  ;;  %723 = vmatprep.subr.bf16.mxu0 %v1454_v8  ;;  %v1471_v19 = vld [vmem:[#allocation5 + $0x130] ss:$8 sps:$4 sm:$0xff]   ;;  %v1474_v21 = vld [vmem:[#allocation5 + $0x124] ss:$8 sps:$4 sm:$0xff]   ;;  %v1476_v22 = vld [vmem:[#allocation5 + $0x20] ss:$8 sps:$4 sm:$0xff]  }
  0x5e   : > { %776 = vmatprep.subr.bf16.mxu1 %v1456_v9  ;;  %v1477_v23 = vld [vmem:[#allocation5 + $0x120] ss:$8 sps:$4 sm:$0xff]   ;;  %v1478_v24 = vld [vmem:[#allocation5 + $0x14] ss:$8 sps:$4 sm:$0xff]   ;;  %v1482_v26 = vld [vmem:[#allocation5 + $0x10] ss:$8 sps:$4 sm:$0xff]  }
  0x5f   : > { %v1480_v25 = vld [vmem:[#allocation5 + $0x114] ss:$8 sps:$4 sm:$0xff]   ;;  %v1483_v27 = vld [vmem:[#allocation5 + $0x110] ss:$8 sps:$4 sm:$0xff]   ;;  %v1484_v28 = vld [vmem:[#allocation5 + $0x4] ss:$8 sps:$4 sm:$0xff]  }
  0x60   : > { %724 = vmatpush1.bf16.msra.mxu0 %v1458_v10  ;;  %v1486_v29 = vld [vmem:[#allocation5 + $0x104] ss:$8 sps:$4 sm:$0xff]   ;;  %v1488_v30 = vld [vmem:[#allocation5] ss:$8 sps:$4 sm:$0xff]   ;;  %v1490_v32 = vld [vmem:[#allocation5 + $0xf4] ss:$8 sps:$4 sm:$0xff]  }
  0x61   : > { %777 = vmatpush1.bf16.msra.mxu1 %v1459_v11  ;;  %725 = vmatprep.subr.bf16.mxu0 %v1460_v12  ;;  %v1489_v31 = vld [vmem:[#allocation5 + $0x100] ss:$8 sps:$4 sm:$0xff]   ;;  %v1492_v33 = vld [vmem:[#allocation5 + $0x1f4] ss:$8 sps:$4 sm:$0xff]   ;;  %v1494_v34 = vld [vmem:[#allocation5 + $0xf0] ss:$8 sps:$4 sm:$0xff]  }
  0x62   : > { %778 = vmatprep.subr.bf16.mxu1 %v1462_v13  ;;  %v1495_v35 = vld [vmem:[#allocation5 + $0x1f0] ss:$8 sps:$4 sm:$0xff]   ;;  %v1496_v36 = vld [vmem:[#allocation5 + $0xe4] ss:$8 sps:$4 sm:$0xff]   ;;  %v1500_v38 = vld [vmem:[#allocation5 + $0xe0] ss:$8 sps:$4 sm:$0xff]  }
  0x63   : > { %v1498_v37 = vld [vmem:[#allocation5 + $0x1e4] ss:$8 sps:$4 sm:$0xff]   ;;  %v1501_v39 = vld [vmem:[#allocation5 + $0x1e0] ss:$8 sps:$4 sm:$0xff]   ;;  %v1502_v40 = vld [vmem:[#allocation5 + $0xd4] ss:$8 sps:$4 sm:$0xff]  }
  0x64   : > { %726 = vmatpush1.bf16.msra.mxu0 %v1464_v14  ;;  %v1504_v41 = vld [vmem:[#allocation5 + $0x1d4] ss:$8 sps:$4 sm:$0xff]   ;;  %v1506_v42 = vld [vmem:[#allocation5 + $0xd0] ss:$8 sps:$4 sm:$0xff]   ;;  %v1508_v44 = vld [vmem:[#allocation5 + $0xc4] ss:$8 sps:$4 sm:$0xff]  }
  0x65   : > { %779 = vmatpush1.bf16.msra.mxu1 %v1465_v15  ;;  %727 = vmatprep.subr.bf16.mxu0 %v1466_v16  ;;  %v1507_v43 = vld [vmem:[#allocation5 + $0x1d0] ss:$8 sps:$4 sm:$0xff]   ;;  %v1510_v45 = vld [vmem:[#allocation5 + $0x1c4] ss:$8 sps:$4 sm:$0xff]   ;;  %v1512_v46 = vld [vmem:[#allocation5 + $0xc0] ss:$8 sps:$4 sm:$0xff]  }
  0x66   : > { %780 = vmatprep.subr.bf16.mxu1 %v1468_v17  ;;  %v1513_v47 = vld [vmem:[#allocation5 + $0x1c0] ss:$8 sps:$4 sm:$0xff]   ;;  %v1514_v48 = vld [vmem:[#allocation5 + $0xb4] ss:$8 sps:$4 sm:$0xff]   ;;  %v1518_v52 = vld [vmem:[#allocation5 + $0xb0] ss:$8 sps:$4 sm:$0xff]  }
  0x67   : > { %v1540_v49 = vld [vmem:[%s1920_s30 + $0x4] ss:$16 sps:$4 sm:$0xff]   ;;  %v1543_v51 = vld [vmem:[%s1920_s30 + $0xc] ss:$16 sps:$4 sm:$0xff]   ;;  %v1519_v53 = vld [vmem:[#allocation5 + $0x1b0] ss:$8 sps:$4 sm:$0xff]  }
  0x68   : > { %728 = vmatpush1.bf16.msra.mxu0 %v1470_v18  ;;  %v1516_v50 = vld [vmem:[#allocation5 + $0x1b4] ss:$8 sps:$4 sm:$0xff]   ;;  %751 = vmatprep.mubr.bf16.mxu0 %v1540_v49  ;;  %v1520_v54 = vld [vmem:[#allocation5 + $0xa4] ss:$8 sps:$4 sm:$0xff]   ;;  %v1524_v56 = vld [vmem:[#allocation5 + $0xa0] ss:$8 sps:$4 sm:$0xff]  }
  0x69   : > { %781 = vmatpush1.bf16.msra.mxu1 %v1471_v19  ;;  %729 = vmatprep.subr.bf16.mxu0 %v1472_v20  ;;  %v1522_v55 = vld [vmem:[#allocation5 + $0x1a4] ss:$8 sps:$4 sm:$0xff]   ;;  %v1525_v57 = vld [vmem:[#allocation5 + $0x1a0] ss:$8 sps:$4 sm:$0xff]   ;;  %v1526_v58 = vld [vmem:[#allocation5 + $0x94] ss:$8 sps:$4 sm:$0xff]  }
  0x6a   : > { %782 = vmatprep.subr.bf16.mxu1 %v1474_v21  ;;  %804 = vmatprep.mubr.bf16.mxu1 %v1543_v51  ;;  %v1528_v59 = vld [vmem:[#allocation5 + $0x194] ss:$8 sps:$4 sm:$0xff]   ;;  %v1530_v60 = vld [vmem:[#allocation5 + $0x90] ss:$8 sps:$4 sm:$0xff]   ;;  %v1532_v62 = vld [vmem:[#allocation5 + $0x84] ss:$8 sps:$4 sm:$0xff]  }
  0x6b   : > { %v1531_v61 = vld [vmem:[#allocation5 + $0x190] ss:$8 sps:$4 sm:$0xff]   ;;  %v1534_v63 = vld [vmem:[#allocation5 + $0x184] ss:$8 sps:$4 sm:$0xff]   ;;  %v1536_v0 = vld [vmem:[#allocation5 + $0x80] ss:$8 sps:$4 sm:$0xff]  }
  0x6c   : > { %730 = vmatpush1.bf16.msra.mxu0 %v1476_v22  ;;  %v1537_v1 = vld [vmem:[#allocation5 + $0x180] ss:$8 sps:$4 sm:$0xff]   ;;  %v1552_v3 = vld [vmem:[#allocation7 + $0x74] ss:$8 sps:$4 sm:$0xff]   ;;  %v1550_v7 = vld [vmem:[#allocation7 + $0x70] ss:$8 sps:$4 sm:$0xff]  }
  0x6d   : > { %783 = vmatpush1.bf16.msra.mxu1 %v1477_v23  ;;  %731 = vmatprep.subr.bf16.mxu0 %v1478_v24  ;;  %v1538_v2 = vld [vmem:[%s1920_s30] ss:$16 sps:$4 sm:$0xff]   ;;  %v1541_v4 = vld [vmem:[%s1920_s30 + $0x8] ss:$16 sps:$4 sm:$0xff]   ;;  %v1544_v5 = vld [vmem:[%s1920_s30 + $0x24] ss:$16 sps:$4 sm:$0xff]  }
  0x6e   : > { %784 = vmatprep.subr.bf16.mxu1 %v1480_v25  ;;  %v1546_v6 = vld [vmem:[%s1920_s30 + $0x2c] ss:$16 sps:$4 sm:$0xff]   ;;  %v1553_v9 = vld [vmem:[#allocation7 + $0x60] ss:$8 sps:$4 sm:$0xff]   ;;  %v1556_v13 = vld [vmem:[#allocation7 + $0x50] ss:$8 sps:$4 sm:$0xff]  }
  0x6f   : > { %v1555_v8 = vld [vmem:[#allocation7 + $0x64] ss:$8 sps:$4 sm:$0xff]   ;;  %v1558_v10 = vld [vmem:[#allocation7 + $0x54] ss:$8 sps:$4 sm:$0xff]   ;;  %v1548_v11 = vld [vmem:[%s1920_s30 + $0x20] ss:$16 sps:$4 sm:$0xff]  }
  0x70   : > { %732 = vmatpush1.bf16.msra.mxu0 %v1482_v26  ;;  %v1549_v12 = vld [vmem:[%s1920_s30 + $0x28] ss:$16 sps:$4 sm:$0xff]   ;;  %v1561_v14 = vld [vmem:[#allocation7 + $0x44] ss:$8 sps:$4 sm:$0xff]   ;;  %v1564_v16 = vld [vmem:[#allocation7 + $0x34] ss:$8 sps:$4 sm:$0xff]  }
  0x71   : > { %785 = vmatpush1.bf16.msra.mxu1 %v1483_v27  ;;  %733 = vmatprep.subr.bf16.mxu0 %v1484_v28  ;;  %v1559_v15 = vld [vmem:[#allocation7 + $0x40] ss:$8 sps:$4 sm:$0xff]   ;;  %v1562_v17 = vld [vmem:[#allocation7 + $0x30] ss:$8 sps:$4 sm:$0xff]   ;;  %v1567_v18 = vld [vmem:[#allocation7 + $0x24] ss:$8 sps:$4 sm:$0xff]  }
  0x72   : > { %786 = vmatprep.subr.bf16.mxu1 %v1486_v29  ;;  %v1565_v19 = vld [vmem:[#allocation7 + $0x20] ss:$8 sps:$4 sm:$0xff]   ;;  %v1570_v20 = vld [vmem:[#allocation7 + $0x14] ss:$8 sps:$4 sm:$0xff]   ;;  %v1568_v21 = vld [vmem:[#allocation7 + $0x10] ss:$8 sps:$4 sm:$0xff]  }
  0x73   : > { %v1573_v22 = vld [vmem:[#allocation7 + $0x4] ss:$8 sps:$4 sm:$0xff]   ;;  %v1571_v23 = vld [vmem:[#allocation7] ss:$8 sps:$4 sm:$0xff]   ;;  %v1576_v24 = vld [vmem:[#allocation7 + $0xf4] ss:$8 sps:$4 sm:$0xff]  }
  0x74   : > { %734 = vmatpush1.bf16.msra.mxu0 %v1488_v30  ;;  %v1574_v25 = vld [vmem:[#allocation7 + $0xf0] ss:$8 sps:$4 sm:$0xff]   ;;  %v1579_v26 = vld [vmem:[#allocation7 + $0xe4] ss:$8 sps:$4 sm:$0xff]   ;;  %v1577_v27 = vld [vmem:[#allocation7 + $0xe0] ss:$8 sps:$4 sm:$0xff]  }
  0x75   : > { %787 = vmatpush1.bf16.msra.mxu1 %v1489_v31  ;;  %735 = vmatprep.subr.bf16.mxu0 %v1490_v32  ;;  %v1582_v28 = vld [vmem:[#allocation7 + $0xd4] ss:$8 sps:$4 sm:$0xff]   ;;  %v1580_v29 = vld [vmem:[#allocation7 + $0xd0] ss:$8 sps:$4 sm:$0xff]   ;;  %v1585_v30 = vld [vmem:[#allocation7 + $0xc4] ss:$8 sps:$4 sm:$0xff]  }
  0x76   : > { %788 = vmatprep.subr.bf16.mxu1 %v1492_v33  ;;  %v1583_v31 = vld [vmem:[#allocation7 + $0xc0] ss:$8 sps:$4 sm:$0xff]   ;;  %v1588_v32 = vld [vmem:[#allocation7 + $0xb4] ss:$8 sps:$4 sm:$0xff]   ;;  %v1586_v33 = vld [vmem:[#allocation7 + $0xb0] ss:$8 sps:$4 sm:$0xff]  }
  0x77   : > { %s272_s11 = scalar_lea.vmem [#allocation8], %s1219_s17  ;;  %s1336_s28 = sshll.u32 %s1809_s22, 10 }
  0x78   : > { %736 = vmatpush2.bf16.msra.mxu0 %v1494_v34  ;;  %v1591_v34 = vld [vmem:[#allocation7 + $0xa4] ss:$8 sps:$4 sm:$0xff]   ;;  %s1117_s12 = sshll.u32 %s272_s11, 4  ;;  %s1952_s9 = scalar_lea.hbm %s1999_s5, %s1336_s28  ;;  %s1947_s12 = int_to_ptr.vmem [resolvable:$true] %s1117_s12 }
  0x79   : > { %789 = vmatpush2.bf16.msra.mxu1 %v1495_v35  ;;  %737 = vmatprep.subr.bf16.mxu0 %v1496_v36  ;;  %v1589_v35 = vld [vmem:[#allocation7 + $0xa0] ss:$8 sps:$4 sm:$0xff]   ;;  %v1594_v36 = vld [vmem:[#allocation7 + $0x94] ss:$8 sps:$4 sm:$0xff]   ;;  %s1103_s13 = scalar_lea.sflag [#allocation4], %s1914_s16  ;;  %s1678_s14 = scalar_lea.vmem %s1947_s12, 1024 }
  0x7a   : > { %790 = vmatprep.subr.bf16.mxu1 %v1498_v37  ;;  %v1592_v37 = vld [vmem:[#allocation7 + $0x90] ss:$8 sps:$4 sm:$0xff]   ;;  %p1679_p10 = scmp.ne.s32.totalorder %s1947_s12, %s1678_s14  ;;  %p2015_p0 = scmp.ne.s32.totalorder %s2009_s23, 0 }
  0x7b   : > { %s1755_s22 = smov [#allocation8]  }
  0x7c   : > { %738 = vmatpush2.bf16.msra.mxu0 %v1500_v38  ;;  %v1597_v38 = vld [vmem:[#allocation7 + $0x84] ss:$8 sps:$4 sm:$0xff]   ;;  %p1680_p1 = pnand %p1679_p10, %p2015_p0  ;;  %s1682_s17 = sshll.u32 %s1755_s22, 4  ;;  %s1683_s17 = int_to_ptr.vmem [resolvable:$false] %s1682_s17 }
  0x7d   : > { %791 = vmatpush2.bf16.msra.mxu1 %v1501_v39  ;;  %739 = vmatprep.subr.bf16.mxu0 %v1502_v40  ;;  %v1595_v39 = vld [vmem:[#allocation7 + $0x80] ss:$8 sps:$4 sm:$0xff]   ;;  %v349_v40 = vlaneseq  ;;  %s1684_s29 = scalar_lea.vmem %s1683_s17, 2048  ;;  %p1685_p6 = scmp.lt.s32.totalorder %s1947_s12, %s1683_s17 }
  0x7e   : > { %792 = vmatprep.subr.bf16.mxu1 %v1504_v41  ;;  %p1681_p2 = pneg %p1680_p1  ;;  %p1686_p11 = scmp.lt.s32.totalorder %s1684_s29, %s1678_s14 }
  0x7f   : > { %v350_v41 = vshrl.u32 %v349_v40, 7 }
  0x80   : > { %740 = vmatpush2.bf16.msra.mxu0 %v1506_v42  ;;  %p1687_p7 = por %p1686_p11, %p1685_p6 }
  0x81   : > { %793 = vmatpush2.bf16.msra.mxu1 %v1507_v43  ;;  %741 = vmatprep.subr.bf16.mxu0 %v1508_v44  ;;  %v355_v42 = vsub.s32 1, %v350_v41  ;;  %v351_v43 = vsub.s32 0, %v350_v41  ;;  %v347_v44 = vld [vmem:[%s1996_s2] sm:$0x3] }
  0x82   : > { %794 = vmatprep.subr.bf16.mxu1 %v1510_v45  ;;  %p1688_p9 = pnand %p1687_p7, %p1681_p2 }
  0x83   : > { %v356_v45 = vrot.slane %v347_v44, %v355_v42 }
  0x84   : > { %742 = vmatpush2.bf16.msra.mxu0 %v1512_v46  ;;  %v352_v46 = vrot.slane %v347_v44, %v351_v43 }
  0x85   : > { %795 = vmatpush2.bf16.msra.mxu1 %v1513_v47  ;;  %743 = vmatprep.subr.bf16.mxu0 %v1514_v48 }
  0x86   : > { %796 = vmatprep.subr.bf16.mxu1 %v1516_v50 }
  0x88   : > { %744 = vmatpush2.bf16.msra.mxu0 %v1518_v52 }
  0x89   : > { %797 = vmatpush2.bf16.msra.mxu1 %v1519_v53  ;;  %745 = vmatprep.subr.bf16.mxu0 %v1520_v54 }
  0x8a   : > { %798 = vmatprep.subr.bf16.mxu1 %v1522_v55 }
  0x8c   : > { %746 = vmatpush2.bf16.msra.mxu0 %v1524_v56 }
  0x8d   : > { %799 = vmatpush2.bf16.msra.mxu1 %v1525_v57  ;;  %747 = vmatprep.subr.bf16.mxu0 %v1526_v58 }
  0x8e   : > { %800 = vmatprep.subr.bf16.mxu1 %v1528_v59 }
  0x90   : > { %748 = vmatpush2.bf16.msra.mxu0 %v1530_v60 }
  0x91   : > { %801 = vmatpush2.bf16.msra.mxu1 %v1531_v61  ;;  %749 = vmatprep.subr.bf16.mxu0 %v1532_v62 }
  0x92   : > { %802 = vmatprep.subr.bf16.mxu1 %v1534_v63 }
  0x94   : > { %750 = vmatpush2.bf16.msra.mxu0 %v1536_v0 }
  0x95   : > { %803 = vmatpush2.bf16.msra.mxu1 %v1537_v1  ;;  %1041 = vmatprep.subr.bf16.mxu0 %v1552_v3 }
  0x96   : > { %1337 = vmatprep.subr.bf16.mxu1 %v1552_v3 }
  0x97   : > { %752 = vmatmul.mubr.bf16.vlgmr.msra.gmra.mxu0 %v1538_v2 }
  0x98   : > { %805 = vmatmul.mubr.bf16.vlgmr.msra.gmra.mxu1 %v1541_v4  ;;  %761 = vmatprep.mubr.bf16.mxu0 %v1544_v5 }
  0x99   : > { %814 = vmatprep.mubr.bf16.mxu1 %v1546_v6  ;;  %1042 = vmatpush1.bf16.msra.mxu0 %v1550_v7 }
  0x9a   : > { %1353 = vmatpush1.bf16.msra.mxu1 %v1550_v7  ;;  %1043 = vmatprep.subr.bf16.mxu0 %v1555_v8 }
  0x9b   : > { %1338 = vmatprep.subr.bf16.mxu1 %v1555_v8 }
  0x9d   : > { %1044 = vmatpush1.bf16.msra.mxu0 %v1553_v9 }
  0x9e   : > { %1354 = vmatpush1.bf16.msra.mxu1 %v1553_v9  ;;  %1045 = vmatprep.subr.bf16.mxu0 %v1558_v10 }
  0x9f   : > { %1339 = vmatprep.subr.bf16.mxu1 %v1558_v10  ;;  %762 = vmatmul.mubr.bf16.gmra.mxu0 %v1548_v11 }
  0xa0   : > { %815 = vmatmul.mubr.bf16.gmra.mxu1 %v1549_v12 }
  0xa1   : > { %1046 = vmatpush1.bf16.msra.mxu0 %v1556_v13 }
  0xa2   : > { %1355 = vmatpush1.bf16.msra.mxu1 %v1556_v13  ;;  %1047 = vmatprep.subr.bf16.mxu0 %v1561_v14 }
  0xa3   : > { %1340 = vmatprep.subr.bf16.mxu1 %v1561_v14 }
  0xa5   : > { %1048 = vmatpush1.bf16.msra.mxu0 %v1559_v15 }
  0xa6   : > { %1356 = vmatpush1.bf16.msra.mxu1 %v1559_v15  ;;  %1049 = vmatprep.subr.bf16.mxu0 %v1564_v16 }
  0xa7   : > { %1341 = vmatprep.subr.bf16.mxu1 %v1564_v16 }
  0xa9   : > { %1050 = vmatpush1.bf16.msra.mxu0 %v1562_v17 }
  0xaa   : > { %1357 = vmatpush1.bf16.msra.mxu1 %v1562_v17  ;;  %1051 = vmatprep.subr.bf16.mxu0 %v1567_v18 }
  0xab   : > { %1342 = vmatprep.subr.bf16.mxu1 %v1567_v18 }
  0xad   : > { %1052 = vmatpush1.bf16.msra.mxu0 %v1565_v19 }
  0xae   : > { %1358 = vmatpush1.bf16.msra.mxu1 %v1565_v19  ;;  %1053 = vmatprep.subr.bf16.mxu0 %v1570_v20 }
  0xaf   : > { %1343 = vmatprep.subr.bf16.mxu1 %v1570_v20 }
  0xb1   : > { %1054 = vmatpush1.bf16.msra.mxu0 %v1568_v21 }
  0xb2   : > { %1359 = vmatpush1.bf16.msra.mxu1 %v1568_v21  ;;  %1055 = vmatprep.subr.bf16.mxu0 %v1573_v22 }
  0xb3   : > { %1344 = vmatprep.subr.bf16.mxu1 %v1573_v22 }
  0xb5   : > { %1056 = vmatpush1.bf16.msra.mxu0 %v1571_v23 }
  0xb6   : > { %1360 = vmatpush1.bf16.msra.mxu1 %v1571_v23  ;;  %1057 = vmatprep.subr.bf16.mxu0 %v1576_v24 }
  0xb7   : > { %1345 = vmatprep.subr.bf16.mxu1 %v1576_v24 }
  0xb9   : > { %1058 = vmatpush2.bf16.msra.mxu0 %v1574_v25 }
  0xba   : > { %1361 = vmatpush2.bf16.msra.mxu1 %v1574_v25  ;;  %1059 = vmatprep.subr.bf16.mxu0 %v1579_v26 }
  0xbb   : > { %1346 = vmatprep.subr.bf16.mxu1 %v1579_v26 }
  0xbd   : > { %1060 = vmatpush2.bf16.msra.mxu0 %v1577_v27 }
  0xbe   : > { %1362 = vmatpush2.bf16.msra.mxu1 %v1577_v27  ;;  %1061 = vmatprep.subr.bf16.mxu0 %v1582_v28  ;;  %v869_v27 = vld [vmem:[%s1998_s4] sm:$0x3] }
  0xbf   : > { %1347 = vmatprep.subr.bf16.mxu1 %v1582_v28  ;;  %v874_v28 = vrot.slane %v869_v27, %v351_v43 }
  0xc1   : > { %1062 = vmatpush2.bf16.msra.mxu0 %v1580_v29 }
  0xc2   : > { %1363 = vmatpush2.bf16.msra.mxu1 %v1580_v29  ;;  %1063 = vmatprep.subr.bf16.mxu0 %v1585_v30  ;;  %v878_v29 = vrot.slane %v869_v27, %v355_v42 }
  0xc3   : > { %1348 = vmatprep.subr.bf16.mxu1 %v1585_v30 }
  0xc5   : > { %1064 = vmatpush2.bf16.msra.mxu0 %v1583_v31 }
  0xc6   : > { %1364 = vmatpush2.bf16.msra.mxu1 %v1583_v31  ;;  %1065 = vmatprep.subr.bf16.mxu0 %v1588_v32 }
  0xc7   : > { %1349 = vmatprep.subr.bf16.mxu1 %v1588_v32 }
  0xc9   : > { %1066 = vmatpush2.bf16.msra.mxu0 %v1586_v33 }
  0xca   : > { %1365 = vmatpush2.bf16.msra.mxu1 %v1586_v33  ;;  %1067 = vmatprep.subr.bf16.mxu0 %v1591_v34 }
  0xcb   : > { %1350 = vmatprep.subr.bf16.mxu1 %v1591_v34 }
  0xcd   : > { %1068 = vmatpush2.bf16.msra.mxu0 %v1589_v35 }
  0xce   : > { %1366 = vmatpush2.bf16.msra.mxu1 %v1589_v35  ;;  %1069 = vmatprep.subr.bf16.mxu0 %v1594_v36 }
  0xcf   : > { %1351 = vmatprep.subr.bf16.mxu1 %v1594_v36 }
  0xd1   : > { %1070 = vmatpush2.bf16.msra.mxu0 %v1592_v37 }
  0xd2   : > { %1367 = vmatpush2.bf16.msra.mxu1 %v1592_v37  ;;  %1071 = vmatprep.subr.bf16.mxu0 %v1597_v38 }
  0xd3   : > { %1352 = vmatprep.subr.bf16.mxu1 %v1597_v38 }
  0xd5   : > { %1072 = vmatpush2.bf16.msra.mxu0 %v1595_v39 }
  0xd6   : > { %1368 = vmatpush2.bf16.msra.mxu1 %v1595_v39 }
 0x157   : > { %v753_v47 = vpop.f32.mrf.mxu0 }
 0x158   : > { %v806_v48 = vpop.f32.mrf.mxu1  ;;  %v754_v52 = vadd.f32 %v753_v47, %v352_v46 }
 0x159   : > { %v755_v49 = vpop.f32.mrf.mxu0 }
 0x15a   : > { %v808_v50 = vpop.f32.mrf.mxu1  ;;  %v756_v51 = vadd.f32 %v755_v49, %v356_v45  ;;  %v807_v61 = vadd.f32 %v806_v48, %v754_v52 }
 0x15b   : > { %v757_v53 = vpop.f32.mrf.mxu0 }
 0x15c   : > { %v810_v54 = vpop.f32.mrf.mxu1  ;;  %v758_v55 = vadd.f32 %v757_v53, %v352_v46  ;;  %v809_v58 = vadd.f32 %v808_v50, %v756_v51  ;;  %v825_v7 = vmax.f32 %v807_v61, 0.0 }
 0x15d   : > { %v759_v56 = vpop.f32.mrf.mxu0 }
 0x15e   : > { %v812_v57 = vpop.f32.mrf.mxu1  ;;  %v811_v59 = vadd.f32 %v810_v54, %v758_v55  ;;  %v760_v60 = vadd.f32 %v759_v56, %v356_v45  ;;  %v826_v4 = vmax.f32 %v809_v58, 0.0 }
 0x15f   : > { %v763_v62 = vpop.f32.mrf.mxu0 }
 0x160   : > { %v816_v63 = vpop.f32.mrf.mxu1  ;;  %v813_v0 = vadd.f32 %v812_v57, %v760_v60  ;;  %v827_v1 = vmax.f32 %v811_v59, 0.0  ;;  %v764_v8 = vadd.f32 %v763_v62, %v352_v46 }
 0x161   : > { %v765_v2 = vpop.f32.mrf.mxu0 }
 0x162   : > { %v818_v3 = vpop.f32.mrf.mxu1  ;;  %v828_v5 = vmax.f32 %v813_v0, 0.0  ;;  %v766_v6 = vadd.f32 %v765_v2, %v356_v45  ;;  %v833_v13 = vpack.c.bf16 %v827_v1, %v825_v7  ;;  %v817_v18 = vadd.f32 %v816_v63, %v764_v8 }
 0x163   : > { %v767_v9 = vpop.f32.mrf.mxu0 }
 0x164   : > { %v820_v10 = vpop.f32.mrf.mxu1  ;;  %v834_v11 = vpack.c.bf16 %v828_v5, %v826_v4  ;;  %v768_v12 = vadd.f32 %v767_v9, %v352_v46  ;;  %v819_v15 = vadd.f32 %v818_v3, %v766_v6  ;;  %v829_v24 = vmax.f32 %v817_v18, 0.0 }
 0x165   : > { %v769_v14 = vpop.f32.mrf.mxu0 }
 0x166   : > { %v821_v16 = vadd.f32 %v820_v10, %v768_v12  ;;  %v770_v17 = vadd.f32 %v769_v14, %v356_v45  ;;  %1073 = vmatprep.mubr.bf16.mxu0 %v834_v11  ;;  %v822_v19 = vpop.f32.mrf.mxu1  ;;  %v830_v22 = vmax.f32 %v819_v15, 0.0 }
 0x167   : > { %1074 = vmatmul.mubr.bf16.vlgmr.msra.gmra.mxu0 %v833_v13 }
 0x168   : > { %v823_v20 = vadd.f32 %v822_v19, %v770_v17  ;;  %v831_v21 = vmax.f32 %v821_v16, 0.0 }
 0x16a   : > { %v832_v23 = vmax.f32 %v823_v20, 0.0  ;;  %v835_v26 = vpack.c.bf16 %v831_v21, %v829_v24 }
 0x16c   : > { %v836_v25 = vpack.c.bf16 %v832_v23, %v830_v22 }
 0x16e   : > { %1083 = vmatprep.mubr.bf16.mxu1 %v836_v25 }
 0x16f   : > { %1084 = vmatmul.mubr.bf16.vlgmr.msra.gmra.mxu1 %v835_v26 }
 0x227   : > { %v1075_v30 = vpop.f32.mrf.mxu0 }
 0x228   : > { %v1076_v31 = vadd.f32 %v1075_v30, %v874_v28 }
 0x229   : > { %v1077_v32 = vpop.f32.mrf.mxu0 }
 0x22a   : > { %1094 = vst [vmem:[%s272_s11] sm:$0xff] %v1076_v31  ;;  %v1078_v33 = vadd.f32 %v1077_v32, %v878_v29 }
 0x22b   : > { %v1079_v34 = vpop.f32.mrf.mxu0 }
 0x22c   : > { %1095 = vst [vmem:[%s272_s11 + $0x8] sm:$0xff] %v1078_v33  ;;  %v1080_v35 = vadd.f32 %v1079_v34, %v874_v28 }
 0x22d   : > { %v1081_v36 = vpop.f32.mrf.mxu0 }
 0x22e   : > { %1096 = vst [vmem:[%s272_s11 + $0x10] sm:$0xff] %v1080_v35  ;;  %v1082_v37 = vadd.f32 %v1081_v36, %v878_v29 }
 0x22f   : > { %v1085_v38 = vpop.f32.mrf.mxu1 }
 0x230   : > { %1097 = vst [vmem:[%s272_s11 + $0x18] sm:$0xff] %v1082_v37  ;;  %v1086_v39 = vadd.f32 %v1085_v38, %v874_v28 }
 0x231   : > { %v1087_v40 = vpop.f32.mrf.mxu1 }
 0x232   : > { %1098 = vst [vmem:[%s272_s11 + $0x20] sm:$0xff] %v1086_v39  ;;  %v1088_v41 = vadd.f32 %v1087_v40, %v878_v29 }
 0x233   : > { %v1089_v42 = vpop.f32.mrf.mxu1 }
 0x234   : > { %1099 = vst [vmem:[%s272_s11 + $0x28] sm:$0xff] %v1088_v41  ;;  %v1090_v43 = vadd.f32 %v1089_v42, %v874_v28 }
 0x235   : > { %v1091_v44 = vpop.f32.mrf.mxu1 }
 0x236   : > { %1100 = vst [vmem:[%s272_s11 + $0x30] sm:$0xff] %v1090_v43  ;;  %v1092_v45 = vadd.f32 %v1091_v44, %v878_v29 }
 0x238   : > { %1101 = vst [vmem:[%s272_s11 + $0x38] sm:$0xff] %v1092_v45 }
 0x239   : > { %1691 = shalt.err (!%p1688_p9)
}
 0x23a   : > { %s1692_s30 = scalar_lea.hbm %s1952_s9, 1024  ;;  %s1696_s8 = scalar_lea.hbm %s1999_s5, 3072 }
 0x23b   : > { %p1693_p12 = scmp.ne.s32.totalorder %s1952_s9, %s1692_s30  ;;  %p1697_p4 = scmp.lt.s32.totalorder %s1952_s9, %s1999_s5 }
 0x23c   : > { %p1698_p8 = scmp.lt.s32.totalorder %s1696_s8, %s1692_s30 }
 0x23d   : > { %p1694_p3 = pnand %p1693_p12, %p2015_p0 }
 0x23e   : > { %p1699_p5 = por %p1698_p8, %p1697_p4 }
 0x23f   : > { %p1695_p13 = pneg %p1694_p3 }
 0x241   : > { %p1700_p10 = pnand %p1699_p5, %p1695_p13 }
 0x243   : > { %1703 = shalt.err (!%p1700_p10)
}
 0x244   : > { %s1756_s28 = smov 256   ;;  %s1757_s6 = smov 16  }
 0x245   : > { %1379 = dma.vmem_to_hbm [thread:$0]  (%p2015_p0), %s1947_s12, 1024, %s1952_s9, %s1103_s13, %s1756_s28, %s1756_s28, %s1757_s6  }
 0x246 PF: > { %p1401_p1 = scmp.ge.s32.totalorder %s1746_s21, 2  ;;  %s1132_s7 = sand.u32 1, %s1734_s18  }
 0x247   : > { %p2016_p2 = scmp.ne.s32.totalorder %s2005_s25, 0  ;;  %s1133_s14 = scalar_lea.sflag [#allocation4], %s1132_s7 }
 0x249   : > { %p1393_p6 = pnand %p1401_p1, %p2016_p2 }
 0x24b   : > { %p1394_p11 = pneg %p1393_p6 }
 0x24d   : > { %1729 = dma.done.wait (%p1394_p11), %s1133_s14, 1024  }
 0x24e   : > { %1731 = vsyncadd (%p1394_p11), %s1133_s14, 4294966272  ;;  %p19_p7 = scmp.ge.s32.totalorder %s1859_s15, 5   ;;  %s2017_s18 = smov %s1738_s19 }
 0x24f   : > { %s2018_s19 = smov %s1742_s20  ;;  %s2019_s20 = smov %s1875_s27 }
 0x250   : > { %s2020_s21 = smov %s1859_s15  ;;  %21 = sbr.rel (!%p19_p7) target bundleno = 6 (0x6), region = 93 }
 0x255   :  { %1138 = vsyncpa [#allocation3], 1 }
 0x256   :  { %1140 = vsyncpa [#allocation3 + $0x1], 1 }
 0x257   :  { %1141 = vsyncpa [#allocation6], 1 }
 0x258   :  { %1142 = vsyncpa [#allocation4], 1 }
 0x259   :  { %1144 = vsyncpa [#allocation4 + $0x1], 1 }

</bundles_post_ra>
